<compile_context>
chip_gen: v5e
topology: v5e:2x2
jax: 0.10.0
libtpu: 0.0.40
codegen_flags: <defaults>
</compile_context>

<pallas_src>
import math
import functools

import jax
import jax.numpy as jnp
from jax.experimental import pallas as pl
from jax.experimental.pallas import tpu as pltpu

_EPS2 = 1e-24  # (F.normalize eps=1e-12)**2 ; max(||v||, eps) == sqrt(max(||v||^2, eps^2))


def _ease_cosine_kernel(x_ref, invx_ref, w_ref, sigma_ref, o_ref, acc_ref,
                        *, groups, tc, reduce_groups, apply_sigma):
    """One (i, j) output tile accumulated over the K grid axis.

    x_ref   : (tm, tk)        input tile (compute dtype -> MXU)
    invx_ref: (tm, 1)  f32    1 / max(||x_row||, eps), precomputed in the wrapper
    w_ref   : (tk, G*tc)      pre-normalized K-major weight slab ([proxy][class] on lanes)
    sigma_ref: (1,)   f32     sigma scalar (SMEM)
    o_ref   : (tm, tc)        output tile (classes on lanes)
    acc_ref : (tm, G*tc) f32  matmul accumulator (persists over the K axis)
    """
    k = pl.program_id(2)
    nk = pl.num_programs(2)

    @pl.when(k == 0)
    def _init():
        acc_ref[...] = jnp.zeros_like(acc_ref)

    # Hot loop: one wide MXU push per K step, nothing else.
    acc_ref[...] += jnp.dot(x_ref[...], w_ref[...], preferred_element_type=jnp.float32)

    @pl.when(k == nk - 1)
    def _finalize():
        inv_x = invx_ref[...]                                   # (tm, 1) f32
        if not reduce_groups:
            scale = inv_x * sigma_ref[0] if apply_sigma else inv_x
            o_ref[...] = (acc_ref[...] * scale).astype(o_ref.dtype)
        else:
            # Pass 1: cosine sims written back into the accumulator in place + running
            # max over the proxy axis (keeps live vregs to ~2 tiles, no list spills).
            c0 = acc_ref[:, 0:tc] * inv_x
            acc_ref[:, 0:tc] = c0
            m = c0
            for p in range(1, groups):                          # static, small (nb_proxy)
                cp = acc_ref[:, p * tc:(p + 1) * tc] * inv_x
                acc_ref[:, p * tc:(p + 1) * tc] = cp
                m = jnp.maximum(m, cp)
            # Pass 2: softmax-over-proxies weighted sum, elementwise across slabs.
            num = jnp.zeros_like(m)
            denom = jnp.zeros_like(m)
            for p in range(groups):
                cp = acc_ref[:, p * tc:(p + 1) * tc]
                ep = jnp.exp(cp - m)
                denom = denom + ep
                num = num + ep * cp
            # EUP reciprocal (free slot) + one Newton step keeps ~f32-exact accuracy.
            r = pl.reciprocal(denom, approx=True)
            r = r * (2.0 - denom * r)
            out = num * r
            if apply_sigma:
                out = out * sigma_ref[0]
            o_ref[...] = out.astype(o_ref.dtype)


def _round_up(x, m):
    return ((x + m - 1) // m) * m


def _fit_tile(dim, unit, cap):
    """Return (tile, padded_dim).

    dim <= cap: one full tile (rounded up to `unit`).  Otherwise prefer the largest
    exact multiple-of-`unit` divisor of the unit-padded dim that is >= cap/2 (zero
    padding waste, no awkwardly small tiles); else pad the dim up to a multiple of cap.
    """
    padded = _round_up(dim, unit)
    if padded <= cap:
        return padded, padded
    t = (cap // unit) * unit
    min_div = max(unit, cap // 2)
    while t >= min_div and padded % t != 0:
        t -= unit
    if t >= min_div:
        return t, padded
    return cap, _round_up(dim, cap)


def ease_cosine_linear_forward(x, weight, sigma, *, nb_proxy=1, to_reduce=False,
                               compute_dtype=None,
                               _tm_cap=256, _tk_cap=1024, _tc_cap=512):
    """Pallas implementation of EaseCosineLinear.forward. Returns {'logits': ...}."""
    B, D = x.shape
    OutP, Dw = weight.shape
    assert D == Dw, "feature-dim mismatch"

    has_sigma = sigma is not None
    will_reduce = to_reduce and nb_proxy > 1
    G = nb_proxy if will_reduce else 1
    if will_reduce:
        assert OutP % nb_proxy == 0, "Shape error"
        C = OutP // nb_proxy          # output columns = classes
    else:
        C = OutP                      # output columns = all proxies

    out_dtype = x.dtype
    cdtype = compute_dtype if compute_dtype is not None else x.dtype

    # ----- tile selection -----
    if B <= _tm_cap:
        tm = _round_up(B, 8)
        B_pad = tm
    else:
        tm = _tm_cap
        B_pad = _round_up(B, _tm_cap)
    tk, D_pad = _fit_tile(D, 128, _tk_cap)
    tc, C_pad = _fit_tile(C, 128, _tc_cap)

    # v7x megacore: if the (i, j) grid degenerates to a single tile, split the N axis so
    # both TensorCores get work ("parallel" axes are sharded across cores).  The extra
    # grid step is negligible on 1-TC chips (v5e/v6e).
    if B_pad // tm == 1 and C_pad // tc == 1 and C_pad >= 256:
        t = (C_pad // 2) // 128 * 128
        while t >= 128 and C_pad % t != 0:
            t -= 128
        if t >= 128:
            tc = t
    nj = C_pad // tc

    # ----- one-time wrapper-side precompute (outside the hot kernel) -----
    xf = x.astype(jnp.float32)
    inv_x = jax.lax.rsqrt(jnp.maximum(jnp.sum(xf * xf, axis=1, keepdims=True), _EPS2))
    inv_x = jnp.pad(inv_x, ((0, B_pad - B), (0, 0)))               # (B_pad, 1) f32

    xp = jnp.pad(x.astype(cdtype), ((0, B_pad - B), (0, D_pad - D)))

    # weight rows are ordered class-major, proxy-minor: row = class*G + proxy.
    # Pre-normalize rows (f32), then lay columns out as [class-tile j][proxy p][class]
    # so each grid step j reads ONE dense (tk, G*tc) slab and the proxy slabs sit at
    # static 128-aligned lane offsets inside the accumulator.
    wf = weight.astype(jnp.float32).reshape(C, G, D)
    wf = wf * jax.lax.rsqrt(jnp.maximum(jnp.sum(wf * wf, axis=-1, keepdims=True), _EPS2))
    wf = jnp.pad(wf, ((0, C_pad - C), (0, 0), (0, D_pad - D)))      # (C_pad, G, D_pad)
    w2 = wf.reshape(nj, tc, G, D_pad)
    w2 = jnp.transpose(w2, (3, 0, 2, 1)).reshape(D_pad, nj * G * tc).astype(cdtype)

    sigma_arr = (jnp.asarray(sigma, jnp.float32).reshape(1)
                 if has_sigma else jnp.ones((1,), jnp.float32))

    grid = (B_pad // tm, nj, D_pad // tk)
    kernel = functools.partial(_ease_cosine_kernel, groups=G, tc=tc,
                               reduce_groups=will_reduce, apply_sigma=has_sigma)

    out = pl.pallas_call(
        kernel,
        out_shape=jax.ShapeDtypeStruct((B_pad, C_pad), out_dtype),
        grid_spec=pltpu.PrefetchScalarGridSpec(
            num_scalar_prefetch=0,
            grid=grid,
            in_specs=[
                pl.BlockSpec((tm, tk), lambda i, j, k: (i, k)),          # x
                pl.BlockSpec((tm, 1), lambda i, j, k: (i, 0)),           # 1/||x||
                pl.BlockSpec((tk, G * tc), lambda i, j, k: (k, j)),      # normalized W
                pl.BlockSpec(memory_space=pltpu.MemorySpace.SMEM),       # sigma scalar
            ],
            out_specs=pl.BlockSpec((tm, tc), lambda i, j, k: (i, j)),
            scratch_shapes=[
                pltpu.VMEM((tm, G * tc), jnp.float32),                   # accumulator
            ],
        ),
        compiler_params=pltpu.CompilerParams(
            dimension_semantics=("parallel", "parallel", "arbitrary"),
            # footprint with tm=256, tk=1024, tc=512, G<=4 (f32) stays ~<= 25 MiB:
            # safe on v7x's 64 MiB physical VMEM, well within v5e/v6e.
            vmem_limit_bytes=48 * 1024 * 1024,
        ),
    )(xp, inv_x, w2, sigma_arr)

    return {"logits": out[:B, :C]}


# ---------------- pure-JAX reference (torch-faithful, for correctness check) ----------------
def _ref_forward(x, weight, sigma, *, nb_proxy, to_reduce):
    eps = 1e-12
    xn = x / jnp.maximum(jnp.linalg.norm(x, axis=1, keepdims=True), eps)
    wn = weight / jnp.maximum(jnp.linalg.norm(weight, axis=1, keepdims=True), eps)
    out = xn @ wn.T
    if to_reduce and nb_proxy > 1:
        bs = out.shape[0]
        nc = out.shape[1] // nb_proxy
        s = out.reshape(bs, nc, nb_proxy)
        att = jax.nn.softmax(s, axis=-1)
        out = jnp.sum(att * s, axis=-1)
    if sigma is not None:
        out = sigma * out
    return out


def _run_case(key, batch, in_features, out_features, nb_proxy, to_reduce, use_sigma,
              sigma_val=1.25, **caps):
    kx, kw = jax.random.split(key)
    stdv = 1.0 / math.sqrt(in_features)
    weight = jax.random.uniform(
        kw, (out_features * nb_proxy, in_features),
        minval=-stdv, maxval=stdv, dtype=jnp.float32)
    x = jax.random.normal(kx, (batch, in_features), dtype=jnp.float32)
    sigma = jnp.float32(sigma_val) if use_sigma else None

    res = ease_cosine_linear_forward(x, weight, sigma,
                                     nb_proxy=nb_proxy, to_reduce=to_reduce, **caps)
    logits = jax.block_until_ready(res["logits"])
    ref = _ref_forward(x, weight, sigma, nb_proxy=nb_proxy, to_reduce=to_reduce)
    assert logits.shape == ref.shape, (logits.shape, ref.shape)
    err = float(jnp.max(jnp.abs(logits - ref)))
    assert jnp.allclose(logits, ref, atol=2e-5, rtol=2e-5), err
    return err


if __name__ == "__main__":
    key = jax.random.PRNGKey(0)
    k1, k2, k3, k4 = jax.random.split(key, 4)

    # Case 1: proxy-reduced path (EaseCosineLinear(32, 10, nb_proxy=2, to_reduce=True))
    _run_case(k1, batch=8, in_features=32, out_features=10,
              nb_proxy=2, to_reduce=True, use_sigma=True)

    # Case 2: plain cosine-linear path with padding-exercising shapes
    _run_case(k2, batch=5, in_features=48, out_features=12,
              nb_proxy=1, to_reduce=False, use_sigma=True)

    # Case 3: reduce path with multiple K steps and multiple class tiles (small tile
    # caps force a real (i, j, k) grid so accumulator init/finalize is exercised)
    _run_case(k3, batch=20, in_features=300, out_features=300,
              nb_proxy=3, to_reduce=True, use_sigma=True,
              _tk_cap=128, _tc_cap=128)

    # Case 4: no-sigma path, class dim big enough to trigger the degenerate-grid N split
    _run_case(k4, batch=4, in_features=40, out_features=260,
              nb_proxy=1, to_reduce=False, use_sigma=False)

    print("KERNEL_OK")
</pallas_src>

<mosaic_0001>
module attributes {stable_mosaic.version = 11 : i64} {
  func.func @_ease_cosine_kernel(%arg0: i32, %arg1: i32, %arg2: i32, %arg3: memref<8x128xf32, #tpu.memory_space<vmem>>, %arg4: memref<8x1xf32, #tpu.memory_space<vmem>>, %arg5: memref<128x256xf32, #tpu.memory_space<vmem>>, %arg6: memref<1xf32, #tpu.memory_space<smem>>, %arg7: memref<8x128xf32, #tpu.memory_space<vmem>>, %arg8: memref<8x256xf32, #tpu.memory_space<vmem>>) attributes {dimension_semantics = [#tpu.dimension_semantics<parallel>, #tpu.dimension_semantics<parallel>, #tpu.dimension_semantics<arbitrary>], iteration_bounds = array<i64: 1, 1, 1>, scalar_prefetch = 0 : i64, scratch_operands = 1 : i64, tpu.core_type = #tpu.core_type<tc>, window_params = [{transform_indices = @transform_0, window_bounds = array<i64: 8, 128>}, {transform_indices = @transform_1, window_bounds = array<i64: 8, 1>}, {transform_indices = @transform_2, window_bounds = array<i64: 128, 256>}, {transform_indices = @transform_3, window_bounds = array<i64: 1>}, {transform_indices = @transform_4, window_bounds = array<i64: 8, 128>}]} {
    %c0_i32 = arith.constant 0 : i32
    %0 = arith.cmpi eq, %arg2, %c0_i32 : i32
    %1 = arith.extui %0 : i1 to i32
    %c0_i32_0 = arith.constant 0 : i32
    %2 = arith.cmpi ne, %1, %c0_i32_0 : i32
    scf.if %2 {
      %cst_10 = arith.constant 0.000000e+00 : f32
      %12 = vector.broadcast %cst_10 : f32 to vector<8x256xf32>
      %c0_11 = arith.constant 0 : index
      %c0_12 = arith.constant 0 : index
      %13 = vector.load %arg8[%c0_11, %c0_12] : memref<8x256xf32, #tpu.memory_space<vmem>>, vector<8x256xf32>
      tpu.vector_store %arg8[%c0_11, %c0_12], %12 {strides = array<i32>} : memref<8x256xf32, #tpu.memory_space<vmem>>, vector<8x256xf32>,
    } else {
    }
    %c0 = arith.constant 0 : index
    %c0_1 = arith.constant 0 : index
    %3 = vector.load %arg8[%c0, %c0_1] : memref<8x256xf32, #tpu.memory_space<vmem>>, vector<8x256xf32>
    %c0_2 = arith.constant 0 : index
    %c0_3 = arith.constant 0 : index
    %4 = vector.load %arg3[%c0_2, %c0_3] : memref<8x128xf32, #tpu.memory_space<vmem>>, vector<8x128xf32>
    %c0_4 = arith.constant 0 : index
    %c0_5 = arith.constant 0 : index
    %5 = vector.load %arg5[%c0_4, %c0_5] : memref<128x256xf32, #tpu.memory_space<vmem>>, vector<128x256xf32>
    %cst = arith.constant dense<0.000000e+00> : vector<8x256xf32>
    %6 = tpu.matmul %4, %5, %cst {dimension_numbers = #tpu.dot_dimension_numbers<[1], [0], [0], [1], [0, 0, 1, 1], [], []>} : vector<8x128xf32>, vector<128x256xf32>, vector<8x256xf32> -> vector<8x256xf32>
    %7 = arith.addf %3, %6 : vector<8x256xf32>
    %c0_6 = arith.constant 0 : index
    %c0_7 = arith.constant 0 : index
    %8 = vector.load %arg8[%c0_6, %c0_7] : memref<8x256xf32, #tpu.memory_space<vmem>>, vector<8x256xf32>
    tpu.vector_store %arg8[%c0_6, %c0_7], %7 {strides = array<i32>} : memref<8x256xf32, #tpu.memory_space<vmem>>, vector<8x256xf32>,
    %c0_i32_8 = arith.constant 0 : i32
    %9 = arith.cmpi eq, %arg2, %c0_i32_8 : i32
    %10 = arith.extui %9 : i1 to i32
    %c0_i32_9 = arith.constant 0 : i32
    %11 = arith.cmpi ne, %10, %c0_i32_9 : i32
    scf.if %11 {
      %c0_10 = arith.constant 0 : index
      %c0_11 = arith.constant 0 : index
      %12 = vector.load %arg4[%c0_10, %c0_11] : memref<8x1xf32, #tpu.memory_space<vmem>>, vector<8x1xf32>
      %c0_12 = arith.constant 0 : index
      %c0_13 = arith.constant 0 : index
      %13 = vector.load %arg8[%c0_12, %c0_13] : memref<8x256xf32, #tpu.memory_space<vmem>>, vector<8x128xf32>
      %14 = vector.broadcast %12 : vector<8x1xf32> to vector<8x128xf32>
      %15 = arith.mulf %13, %14 : vector<8x128xf32>
      %c0_14 = arith.constant 0 : index
      %c0_15 = arith.constant 0 : index
      %16 = vector.load %arg8[%c0_14, %c0_15] : memref<8x256xf32, #tpu.memory_space<vmem>>, vector<8x128xf32>
      tpu.vector_store %arg8[%c0_14, %c0_15], %15 {strides = array<i32>} : memref<8x256xf32, #tpu.memory_space<vmem>>, vector<8x128xf32>,
      %c0_16 = arith.constant 0 : index
      %c128 = arith.constant 128 : index
      %17 = vector.load %arg8[%c0_16, %c128] : memref<8x256xf32, #tpu.memory_space<vmem>>, vector<8x128xf32>
      %18 = vector.broadcast %12 : vector<8x1xf32> to vector<8x128xf32>
      %19 = arith.mulf %17, %18 : vector<8x128xf32>
      %c0_17 = arith.constant 0 : index
      %c128_18 = arith.constant 128 : index
      %20 = vector.load %arg8[%c0_17, %c128_18] : memref<8x256xf32, #tpu.memory_space<vmem>>, vector<8x128xf32>
      tpu.vector_store %arg8[%c0_17, %c128_18], %19 {strides = array<i32>} : memref<8x256xf32, #tpu.memory_space<vmem>>, vector<8x128xf32>,
      %21 = arith.maximumf %15, %19 : vector<8x128xf32>
      %cst_19 = arith.constant 0.000000e+00 : f32
      %22 = vector.broadcast %cst_19 : f32 to vector<8x128xf32>
      %cst_20 = arith.constant 0.000000e+00 : f32
      %23 = vector.broadcast %cst_20 : f32 to vector<8x128xf32>
      %c0_21 = arith.constant 0 : index
      %c0_22 = arith.constant 0 : index
      %24 = vector.load %arg8[%c0_21, %c0_22] : memref<8x256xf32, #tpu.memory_space<vmem>>, vector<8x128xf32>
      %25 = arith.subf %24, %21 : vector<8x128xf32>
      %26 = math.exp %25 : vector<8x128xf32>
      %27 = arith.addf %23, %26 : vector<8x128xf32>
      %28 = arith.mulf %26, %24 : vector<8x128xf32>
      %29 = arith.addf %22, %28 : vector<8x128xf32>
      %c0_23 = arith.constant 0 : index
      %c128_24 = arith.constant 128 : index
      %30 = vector.load %arg8[%c0_23, %c128_24] : memref<8x256xf32, #tpu.memory_space<vmem>>, vector<8x128xf32>
      %31 = arith.subf %30, %21 : vector<8x128xf32>
      %32 = math.exp %31 : vector<8x128xf32>
      %33 = arith.addf %27, %32 : vector<8x128xf32>
      %34 = arith.mulf %32, %30 : vector<8x128xf32>
      %35 = arith.addf %29, %34 : vector<8x128xf32>
      %36 = tpu.reciprocal %33 {approx = true} : vector<8x128xf32> -> vector<8x128xf32>
      %37 = arith.mulf %33, %36 : vector<8x128xf32>
      %cst_25 = arith.constant 2.000000e+00 : f32
      %38 = vector.broadcast %cst_25 : f32 to vector<8x128xf32>
      %39 = arith.subf %38, %37 : vector<8x128xf32>
      %40 = arith.mulf %36, %39 : vector<8x128xf32>
      %41 = arith.mulf %35, %40 : vector<8x128xf32>
      %c0_26 = arith.constant 0 : index
      %42 = memref.load %arg6[%c0_26] : memref<1xf32, #tpu.memory_space<smem>>
      %43 = vector.broadcast %42 : f32 to vector<8x128xf32>
      %44 = arith.mulf %41, %43 : vector<8x128xf32>
      %c0_27 = arith.constant 0 : index
      %c0_28 = arith.constant 0 : index
      %45 = vector.load %arg7[%c0_27, %c0_28] : memref<8x128xf32, #tpu.memory_space<vmem>>, vector<8x128xf32>
      tpu.vector_store %arg7[%c0_27, %c0_28], %44 {strides = array<i32>} : memref<8x128xf32, #tpu.memory_space<vmem>>, vector<8x128xf32>,
    } else {
    }
    return
  }
  func.func @transform_0(%arg0: i32, %arg1: i32, %arg2: i32) -> (i32, i32) {
    %c0_i32 = arith.constant 0 : i32
    return %arg0, %arg2 : i32, i32
  }
  func.func @transform_1(%arg0: i32, %arg1: i32, %arg2: i32) -> (i32, i32) {
    %c0_i32 = arith.constant 0 : i32
    %c0_i32_0 = arith.constant 0 : i32
    return %arg0, %c0_i32 : i32, i32
  }
  func.func @transform_2(%arg0: i32, %arg1: i32, %arg2: i32) -> (i32, i32) {
    %c0_i32 = arith.constant 0 : i32
    return %arg2, %arg1 : i32, i32
  }
  func.func @transform_3(%arg0: i32, %arg1: i32, %arg2: i32) -> i32 {
    %c0_i32 = arith.constant 0 : i32
    %c0_i32_0 = arith.constant 0 : i32
    return %c0_i32 : i32
  }
  func.func @transform_4(%arg0: i32, %arg1: i32, %arg2: i32) -> (i32, i32) {
    %c0_i32 = arith.constant 0 : i32
    return %arg0, %arg1 : i32, i32
  }
}

</mosaic_0001>

<bundles_post_ra>
// kernel: tpu_custom_call.1
= control target key start
LH: loop header
LB: loop body
LE: loop exit
PB: predicated region body
PF: predicated region fallthrough
CT: control target
= control target key end

     0   :  { %10 = vsyncpa [#allocation5], 0  ;;  %s285_s0 = inlined_call_operand.vmem [shape: f32[8,128], index: 0, kind: input, shape index: {}]   ;;  %s286_s1 = inlined_call_operand.vmem [shape: f32[8,1], index: 1, kind: input, shape index: {}]   ;;  %s287_s2 = inlined_call_operand.hbm [shape: f32[128,256], index: 2, kind: input, shape index: {}]   ;;  %s288_s3 = inlined_call_operand.<no memory space> [shape: f32[1], index: 3, kind: input, shape index: {}]   ;;  %s289_s4 = inlined_call_operand.hbm [shape: f32[8,128], index: 4, kind: output, shape index: {}]  }
   0x1   :  { %11 = vsyncpa [#allocation6], 0  ;;  %s20_s17 = sshll.u32 %s287_s2, 4  ;;  %s240_s18 = smov [#allocation4]   ;;  %s21_s17 = int_to_ptr.hbm [resolvable:$true] %s20_s17 }
   0x2   :  { %s22_s19 = sshll.u32 %s240_s18, 4  ;;  %s241_s20 = smov 256   ;;  %s23_s19 = int_to_ptr.vmem [resolvable:$true] %s22_s19 }
   0x3   :  { %s242_s21 = smov 16  }
   0x4   :  { %28 = dma.hbm_to_vmem [thread:$0]  %s21_s17, 4096, %s23_s19, [#allocation5], %s241_s20, %s241_s20, %s242_s21  }
   0x5   :  { %236 = dma.done.wait [#allocation5], 4096  }
   0x6   :  { %237 = vsyncadd [#allocation5], 4294963200  ;;  %v74_v0 = vld [vmem:[#allocation4 + $0xf0] sm:$0xff]  ;;  %v75_v1 = vld [vmem:[#allocation4 + $0xf8] sm:$0xff]  ;;  %v243_v6 = vmov 0   ;;  %v156_v55 = vstv %s288_s3  ;;  %s244_s25 = smov [#allocation7]  }
   0x7   :  { %v72_v2 = vld [vmem:[#allocation4 + $0xe0] sm:$0xff]  ;;  %76 = vmatpush.msra.mxu0 %v74_v0  ;;  %96 = vmatpush.msra.mxu1 %v75_v1  ;;  %v73_v3 = vld [vmem:[#allocation4 + $0xe8] sm:$0xff]  ;;  %v70_v4 = vld [vmem:[#allocation4 + $0xd0] sm:$0xff]  ;;  %s164_s26 = sshll.u32 %s244_s25, 4  ;;  %s166_s29 = sshll.u32 %s289_s4, 4  ;;  %s165_s26 = int_to_ptr.vmem [resolvable:$true] %s164_s26  ;;  %s167_s29 = int_to_ptr.hbm [resolvable:$true] %s166_s29 }
   0x8   :  { %v71_v5 = vld [vmem:[#allocation4 + $0xd8] sm:$0xff]  ;;  %181 = vset.pattern.permute.xlu0 %v243_v6  ;;  %v68_v7 = vld [vmem:[#allocation4 + $0xc0] sm:$0xff]  ;;  %v69_v8 = vld [vmem:[#allocation4 + $0xc8] sm:$0xff] }
   0x9   :  { %77 = vmatpush.msra.mxu0 %v72_v2  ;;  %97 = vmatpush.msra.mxu1 %v73_v3  ;;  %v66_v9 = vld [vmem:[#allocation4 + $0xb0] sm:$0xff]  ;;  %v67_v10 = vld [vmem:[#allocation4 + $0xb8] sm:$0xff]  ;;  %v64_v11 = vld [vmem:[#allocation4 + $0xa0] sm:$0xff] }
   0xa   :  { %v65_v12 = vld [vmem:[#allocation4 + $0xa8] sm:$0xff]  ;;  %v62_v13 = vld [vmem:[#allocation4 + $0x90] sm:$0xff]  ;;  %v63_v14 = vld [vmem:[#allocation4 + $0x98] sm:$0xff] }
   0xb   :  { %78 = vmatpush.msra.mxu0 %v70_v4  ;;  %98 = vmatpush.msra.mxu1 %v71_v5  ;;  %v123_v15 = vld [vmem:[%s286_s1] sm:$0xff]  ;;  %v61_v17 = vld [vmem:[#allocation4 + $0x88] sm:$0xff]  ;;  %v58_v18 = vld [vmem:[#allocation4 + $0x70] sm:$0xff] }
   0xc   :  { %v60_v16 = vld [vmem:[#allocation4 + $0x80] sm:$0xff]  ;;  %127 = vperm.xlu0 %181, %v123_v15   ;;  %v59_v19 = vld [vmem:[#allocation4 + $0x78] sm:$0xff]  ;;  %v57_v21 = vld [vmem:[#allocation4 + $0x68] sm:$0xff] }
   0xd   :  { %79 = vmatpush.msra.mxu0 %v68_v7  ;;  %99 = vmatpush.msra.mxu1 %v69_v8  ;;  %v56_v20 = vld [vmem:[#allocation4 + $0x60] sm:$0xff]  ;;  %v54_v22 = vld [vmem:[#allocation4 + $0x50] sm:$0xff]  ;;  %v55_v23 = vld [vmem:[#allocation4 + $0x58] sm:$0xff] }
   0xe   :  { %v52_v24 = vld [vmem:[#allocation4 + $0x40] sm:$0xff]  ;;  %v53_v25 = vld [vmem:[#allocation4 + $0x48] sm:$0xff]  ;;  %v50_v26 = vld [vmem:[#allocation4 + $0x30] sm:$0xff] }
   0xf   :  { %80 = vmatpush.msra.mxu0 %v66_v9  ;;  %100 = vmatpush.msra.mxu1 %v67_v10  ;;  %v51_v27 = vld [vmem:[#allocation4 + $0x38] sm:$0xff]  ;;  %v48_v28 = vld [vmem:[#allocation4 + $0x20] sm:$0xff]  ;;  %v49_v29 = vld [vmem:[#allocation4 + $0x28] sm:$0xff] }
  0x10   :  { %v46_v30 = vld [vmem:[#allocation4 + $0x10] sm:$0xff]  ;;  %v47_v31 = vld [vmem:[#allocation4 + $0x18] sm:$0xff]  ;;  %v44_v32 = vld [vmem:[#allocation4] sm:$0xff] }
  0x11   :  { %81 = vmatpush.msra.mxu0 %v64_v11  ;;  %101 = vmatpush.msra.mxu1 %v65_v12  ;;  %v45_v33 = vld [vmem:[#allocation4 + $0x8] sm:$0xff]  ;;  %v43_v34 = vld [vmem:[%s285_s0] sm:$0xff] }
  0x13   :  { %82 = vmatpush.msra.mxu0 %v62_v13  ;;  %102 = vmatpush.msra.mxu1 %v63_v14 }
  0x15   :  { %83 = vmatpush.msra.mxu0 %v60_v16  ;;  %103 = vmatpush.msra.mxu1 %v61_v17 }
  0x17   :  { %84 = vmatpush.msra.mxu0 %v58_v18  ;;  %104 = vmatpush.msra.mxu1 %v59_v19 }
  0x19   :  { %85 = vmatpush.msra.mxu0 %v56_v20  ;;  %105 = vmatpush.msra.mxu1 %v57_v21 }
  0x1b   :  { %86 = vmatpush.msra.mxu0 %v54_v22  ;;  %106 = vmatpush.msra.mxu1 %v55_v23 }
  0x1d   :  { %87 = vmatpush.msra.mxu0 %v52_v24  ;;  %107 = vmatpush.msra.mxu1 %v53_v25 }
  0x1f   :  { %88 = vmatpush.msra.mxu0 %v50_v26  ;;  %108 = vmatpush.msra.mxu1 %v51_v27 }
  0x21   :  { %89 = vmatpush.msra.mxu0 %v48_v28  ;;  %109 = vmatpush.msra.mxu1 %v49_v29 }
  0x23   :  { %90 = vmatpush.msra.mxu0 %v46_v30  ;;  %110 = vmatpush.msra.mxu1 %v47_v31 }
  0x25   :  { %91 = vmatpush.msra.mxu0 %v44_v32  ;;  %111 = vmatpush.msra.mxu1 %v45_v33 }
  0x26   :  { %92 = vmatmul.f32.vlgmr.msra.gmra.mxu0 %v43_v34  ;;  %112 = vmatmul.f32.vlgmr.msra.gmra.mxu1 %v43_v34 }
  0x7e   :  { %v128_v35 = vpop.permute.xlu0 %127 }
  0xa3   :  { %v93_v36 = vpop.f32.mrf.mxu0  ;;  %v113_v37 = vpop.f32.mrf.mxu1 }
  0xa4   :  { %v130_v38 = vmul.f32 %v128_v35, %v93_v36  ;;  %v133_v39 = vmul.f32 %v128_v35, %v113_v37 }
  0xa6   :  { %v135_v40 = vmax.f32 %v130_v38, %v133_v39 }
  0xa8   :  { %v137_v41 = vsub.f32 %v130_v38, %v135_v40  ;;  %v144_v42 = vsub.f32 %v133_v39, %v135_v40 }
  0xaa   :  { %v138_v43 = vmul.f32 1.442695, %v137_v41  ;;  %v145_v44 = vmul.f32 1.442695, %v144_v42 }
  0xac   :  { %182 = vpow2.f32 %v138_v43 }
  0xad   :  { %184 = vpow2.f32 %v145_v44 }
  0xb2   :  { %v183_v45 = vpop.eup %182 }
  0xb3   :  { %v185_v46 = vpop.eup %184  ;;  %v141_v49 = vmul.f32 %v183_v45, %v130_v38 }
  0xb4   :  { %v147_v47 = vadd.f32 %v185_v46, %v183_v45  ;;  %v148_v50 = vmul.f32 %v185_v46, %v133_v39 }
  0xb6   :  { %186 = vrcp.f32 %v147_v47  ;;  %v149_v53 = vadd.f32 %v148_v50, %v141_v49 }
  0xbc   :  { %v187_v48 = vpop.eup %186 }
  0xbd   :  { %v151_v51 = vmul.f32 %v187_v48, %v147_v47 }
  0xbf   :  { %v152_v52 = vsub.f32 2.0, %v151_v51 }
  0xc1   :  { %v153_v54 = vmul.f32 %v187_v48, %v152_v52 }
  0xc3   :  { %v154_v56 = vmul.f32 %v153_v54, %v149_v53 }
  0xc5   :  { %v157_v57 = vmul.f32 %v156_v55, %v154_v56 }
  0xc7   :  { %158 = vst [vmem:[#allocation7] sm:$0xff] %v157_v57 }
  0xc8   :  { %169 = dma.vmem_to_hbm [thread:$0]  %s165_s26, 128, %s167_s29, [#allocation6]  }
  0xc9   :  { %238 = dma.done.wait [#allocation6], 128  }
  0xca   :  { %239 = vsyncadd [#allocation6], 4294967168 }
  0xcb   :  { %174 = vsyncpa [#allocation5], 1 }
  0xcc   :  { %175 = vsyncpa [#allocation6], 1 }

</bundles_post_ra>
